<compile_context>
chip_gen: v7x
topology: tpu7x:2x2x1
jax: 0.10.0
libtpu: 0.0.40
codegen_flags: <defaults>
</compile_context>

<pallas_src>
import jax
import jax.numpy as jnp
from jax.experimental import pallas as pl
from jax.experimental.pallas import tpu as pltpu


def _downsample_kernel(ee_hbm, eo_hbm, oe_ref, oo_ref, w_ref, b_ref, o_ref,
                       ee_buf, eo_buf, patch_ref, sem):
    """One (batch, row-tile) grid step.

    ee_hbm/eo_hbm : (N, HoT+1, Wop, Cpad) even-input-row parity planes in HBM
                    (pl.ANY); th+1 overlapping rows are DMA'd manually per step.
    oe_ref/oo_ref : (1, TH, Wop, Cpad) odd-input-row parity planes (pipelined).
    w_ref         : (9*Cpad, Cpad) weight slab, row block t = kh*3 + kw.
    b_ref         : (1, Cpad) f32 bias.
    o_ref         : (1, TH*Wo_pad, Cpad) flattened output tile (dense store).
    ee_buf/eo_buf : (TH+1, Wop, Cpad) VMEM landing buffers for the manual DMAs.
    patch_ref     : (TH, Wo_pad, 9*Cpad) im2col scratch (input dtype).
    sem           : DMA semaphores, shape (2,).
    """
    th, wo = patch_ref.shape[0], patch_ref.shape[1]      # wo == Wo_pad (8-mult)
    cp = o_ref.shape[2]                                   # Cpad (128-mult)
    b_i = pl.program_id(0)
    r_i = pl.program_id(1)
    row0 = r_i * th

    cp_ee = pltpu.make_async_copy(ee_hbm.at[b_i, pl.ds(row0, th + 1)],
                                  ee_buf, sem.at[0])
    cp_eo = pltpu.make_async_copy(eo_hbm.at[b_i, pl.ds(row0, th + 1)],
                                  eo_buf, sem.at[1])
    cp_ee.start()
    cp_eo.start()

    # kh == 1 taps come from the pipelined OE/OO blocks; doing them first
    # overlaps these tap copies with the EE/EO row-window DMAs.
    patch_ref[:, :, 3 * cp:4 * cp] = oe_ref[0, :, 0:wo, :]
    patch_ref[:, :, 4 * cp:5 * cp] = oo_ref[0, :, 0:wo, :]
    patch_ref[:, :, 5 * cp:6 * cp] = oe_ref[0, :, 1:1 + wo, :]

    cp_ee.wait()
    cp_eo.wait()

    # kh == 0 taps: even input rows 2*i      -> ee/eo local rows [0, th).
    patch_ref[:, :, 0 * cp:1 * cp] = ee_buf[0:th, 0:wo, :]
    patch_ref[:, :, 1 * cp:2 * cp] = eo_buf[0:th, 0:wo, :]
    patch_ref[:, :, 2 * cp:3 * cp] = ee_buf[0:th, 1:1 + wo, :]
    # kh == 2 taps: even input rows 2*i + 2  -> ee/eo local rows [1, th+1).
    patch_ref[:, :, 6 * cp:7 * cp] = ee_buf[1:th + 1, 0:wo, :]
    patch_ref[:, :, 7 * cp:8 * cp] = eo_buf[1:th + 1, 0:wo, :]
    patch_ref[:, :, 8 * cp:9 * cp] = ee_buf[1:th + 1, 1:1 + wo, :]

    # Single MXU matmul, K = 9*Cpad, f32 accumulation inside the MXU.
    lhs = patch_ref[...].reshape(th * wo, 9 * cp)     # free view: wo % 8 == 0
    acc = jnp.dot(lhs, w_ref[...], preferred_element_type=jnp.float32)
    o_ref[0] = (acc + b_ref[...]).astype(o_ref.dtype)   # f32 epilogue, one cast


def _round_up(v, m):
    return (v + m - 1) // m * m


@jax.jit
def downsample_pallas(x_nchw, weight_oihw, bias):
    """Equivalent of nn.Conv2d(dim, dim, 3, stride=2, padding=1)(x_nchw)."""
    n, c, h, w = x_nchw.shape
    ho, wo = (h + 1) // 2, (w + 1) // 2
    cpad = _round_up(c, 128)          # lane-dense channels
    wo_pad = _round_up(wo, 8)         # sublane-dense output columns
    wop = wo_pad + 1                  # planes carry one extra column for kw=2
    dt = x_nchw.dtype
    itm = jnp.dtype(dt).itemsize

    # Row-tile size: target M = TH*Wo_pad ~ 512 MXU rows, bounded by Ho and by a
    # VMEM budget that stays comfortable on v7x (64 MiB physical VMEM).
    th = max(1, min(ho, 512 // wo_pad))
    # v7x has 2 TensorCores: make sure the parallel grid has >= 2 steps.
    if n == 1 and th >= ho and ho >= 2:
        th = (ho + 1) // 2

    def est_vmem(t):
        m = t * wo_pad
        oeoo = 2 * 2 * t * wop * cpad * itm            # 2 planes, double-buffered
        eeeo = 2 * (t + 1) * wop * cpad * itm          # manual DMA buffers
        patch = m * 9 * cpad * itm                     # im2col scratch
        wslab = 2 * 9 * cpad * cpad * itm              # weight slab (2 buffers)
        outb = 2 * m * cpad * itm                      # output, double-buffered
        accb = m * cpad * 4                            # f32 matmul result
        return oeoo + eeeo + patch + wslab + outb + accb

    while th > 1 and est_vmem(th) > 36 * 1024 * 1024:
        th = (th + 1) // 2

    nr = -(-ho // th)
    hot = nr * th

    # NCHW -> NHWC; pad channels to Cpad; zero-pad space (conv padding=1 on the
    # top/left) so the padded image is exactly (2*(HoT+1)) x (2*(Wo_pad+1)).
    hp, wp = 2 * (hot + 1), 2 * (wo_pad + 1)
    x_nhwc = jnp.transpose(x_nchw, (0, 2, 3, 1))
    xpad = jnp.pad(x_nhwc, ((0, 0), (1, hp - h - 1), (1, wp - w - 1),
                            (0, cpad - c)))

    # 2x2 parity split: xr[n, i, rp, j, cq, :] = xpad[n, 2i+rp, 2j+cq, :]
    xr = xpad.reshape(n, hot + 1, 2, wo_pad + 1, 2, cpad)
    ee = xr[:, :, 0, :, 0, :]                 # (N, HoT+1, Wop, Cpad)
    eo = xr[:, :, 0, :, 1, :]                 # (N, HoT+1, Wop, Cpad)
    oe = xr[:, :hot, 1, :, 0, :]              # (N, HoT,   Wop, Cpad)
    oo = xr[:, :hot, 1, :, 1, :]              # (N, HoT,   Wop, Cpad)

    # OIHW -> (kh*3+kw, Cin, Cout) -> zero-padded (9*Cpad, Cpad) slab (input dtype).
    w_taps = jnp.transpose(weight_oihw, (2, 3, 1, 0)).reshape(9, c, c)
    w_taps = jnp.pad(w_taps, ((0, 0), (0, cpad - c), (0, cpad - c)))
    w_slab = w_taps.reshape(9 * cpad, cpad).astype(dt)
    b2d = jnp.pad(bias, (0, cpad - c)).reshape(1, cpad).astype(jnp.float32)

    oddp_spec = pl.BlockSpec((1, th, wop, cpad), lambda i, r: (i, r, 0, 0))
    hbm_spec = pl.BlockSpec(memory_space=pl.ANY)
    w_spec = pl.BlockSpec((9 * cpad, cpad), lambda i, r: (0, 0))
    b_spec = pl.BlockSpec((1, cpad), lambda i, r: (0, 0))

    out_flat = pl.pallas_call(
        _downsample_kernel,
        out_shape=jax.ShapeDtypeStruct((n, hot * wo_pad, cpad), dt),
        grid_spec=pltpu.PrefetchScalarGridSpec(
            num_scalar_prefetch=0,
            grid=(n, nr),
            in_specs=[hbm_spec, hbm_spec, oddp_spec, oddp_spec, w_spec, b_spec],
            out_specs=pl.BlockSpec((1, th * wo_pad, cpad),
                                   lambda i, r: (i, r, 0)),
            scratch_shapes=[
                pltpu.VMEM((th + 1, wop, cpad), dt),    # ee landing buffer
                pltpu.VMEM((th + 1, wop, cpad), dt),    # eo landing buffer
                pltpu.VMEM((th, wo_pad, 9 * cpad), dt),  # im2col patch
                pltpu.SemaphoreType.DMA((2,)),
            ]),
        compiler_params=pltpu.CompilerParams(
            dimension_semantics=("parallel", "parallel"),
            vmem_limit_bytes=48 * 1024 * 1024),
    )(ee, eo, oe, oo, w_slab, b2d)

    out = out_flat.reshape(n, hot, wo_pad, cpad)[:, :ho, :wo, :c]
    return jnp.transpose(out, (0, 3, 1, 2))     # NHWC -> NCHW


if __name__ == "__main__":
    key = jax.random.PRNGKey(0)
    k_x, k_w, k_b = jax.random.split(key, 3)

    N, C, H, W = 2, 4, 16, 16
    x = jax.random.normal(k_x, (N, C, H, W), dtype=jnp.float32)

    # Deterministic parameter init mimicking nn.Conv2d default (uniform(-b, b)).
    fan_in = C * 3 * 3
    bound = 1.0 / (fan_in ** 0.5)
    weight = jax.random.uniform(k_w, (C, C, 3, 3), jnp.float32, -bound, bound)
    bias = jax.random.uniform(k_b, (C,), jnp.float32, -bound, bound)

    out = downsample_pallas(x, weight, bias)
    out = jax.block_until_ready(out)

    # Self-check against XLA's conv.
    ref = jax.lax.conv_general_dilated(
        x, weight, window_strides=(2, 2), padding=((1, 1), (1, 1)),
        dimension_numbers=("NCHW", "OIHW", "NCHW"))
    ref = ref + bias[None, :, None, None]
    assert out.shape == (N, C, (H + 1) // 2, (W + 1) // 2)
    err = float(jnp.max(jnp.abs(out - ref)))
    assert jnp.allclose(out, ref, atol=1e-3, rtol=1e-3), err

    print("KERNEL_OK")
</pallas_src>

<mosaic_0001>
module attributes {stable_mosaic.version = 11 : i64} {
  func.func @_downsample_kernel(%arg0: i32, %arg1: i32, %arg2: memref<2x9x9x128xf32, #tpu.memory_space<any>>, %arg3: memref<2x9x9x128xf32, #tpu.memory_space<any>>, %arg4: memref<1x8x9x128xf32, #tpu.memory_space<vmem>>, %arg5: memref<1x8x9x128xf32, #tpu.memory_space<vmem>>, %arg6: memref<1152x128xf32, #tpu.memory_space<vmem>>, %arg7: memref<1x128xf32, #tpu.memory_space<vmem>>, %arg8: memref<1x64x128xf32, #tpu.memory_space<vmem>>, %arg9: memref<9x9x128xf32, #tpu.memory_space<vmem>>, %arg10: memref<9x9x128xf32, #tpu.memory_space<vmem>>, %arg11: memref<8x8x1152xf32, #tpu.memory_space<vmem>>, %arg12: memref<2x!tpu.dma_semaphore, #tpu.memory_space<semaphore_mem>>) attributes {dimension_semantics = [#tpu.dimension_semantics<parallel>, #tpu.dimension_semantics<parallel>], iteration_bounds = array<i64: 2, 1>, scalar_prefetch = 0 : i64, scratch_operands = 4 : i64, tpu.core_type = #tpu.core_type<tc>, window_params = [{}, {}, {transform_indices = @transform_2, window_bounds = array<i64: 1, 8, 9, 128>}, {transform_indices = @transform_3, window_bounds = array<i64: 1, 8, 9, 128>}, {pipeline_mode = #tpu.pipeline_mode<synchronous>, transform_indices = @transform_4, window_bounds = array<i64: 1152, 128>}, {pipeline_mode = #tpu.pipeline_mode<synchronous>, transform_indices = @transform_5, window_bounds = array<i64: 1, 128>}, {transform_indices = @transform_6, window_bounds = array<i64: 1, 64, 128>}]} {
    %c8_i32 = arith.constant 8 : i32
    %0 = arith.muli %arg1, %c8_i32 : i32
    %c0_i32 = arith.constant 0 : i32
    %c0_i32_0 = arith.constant 0 : i32
    %c0_i32_1 = arith.constant 0 : i32
    %1 = tpu.memref_slice %arg2[%arg0, %0, %c0_i32_0, %c0_i32_1] : memref<2x9x9x128xf32, #tpu.memory_space<any>> -> memref<1x9x9x128xf32, #tpu.memory_space<any>>
    %2 = tpu.memref_squeeze %1 : memref<1x9x9x128xf32, #tpu.memory_space<any>> -> memref<9x9x128xf32, #tpu.memory_space<any>>
    %3 = tpu.memref_slice %arg12[%c0_i32] : memref<2x!tpu.dma_semaphore, #tpu.memory_space<semaphore_mem>> -> memref<1x!tpu.dma_semaphore, #tpu.memory_space<semaphore_mem>>
    %4 = tpu.memref_squeeze %3 : memref<1x!tpu.dma_semaphore, #tpu.memory_space<semaphore_mem>> -> memref<!tpu.dma_semaphore, #tpu.memory_space<semaphore_mem>>
    tpu.enqueue_dma source(%2 : memref<9x9x128xf32, #tpu.memory_space<any>>) target(%arg9 : memref<9x9x128xf32, #tpu.memory_space<vmem>>) target_semaphore(%4 : memref<!tpu.dma_semaphore, #tpu.memory_space<semaphore_mem>>)
    %c1_i32 = arith.constant 1 : i32
    %c0_i32_2 = arith.constant 0 : i32
    %c0_i32_3 = arith.constant 0 : i32
    %5 = tpu.memref_slice %arg3[%arg0, %0, %c0_i32_2, %c0_i32_3] : memref<2x9x9x128xf32, #tpu.memory_space<any>> -> memref<1x9x9x128xf32, #tpu.memory_space<any>>
    %6 = tpu.memref_squeeze %5 : memref<1x9x9x128xf32, #tpu.memory_space<any>> -> memref<9x9x128xf32, #tpu.memory_space<any>>
    %7 = tpu.memref_slice %arg12[%c1_i32] : memref<2x!tpu.dma_semaphore, #tpu.memory_space<semaphore_mem>> -> memref<1x!tpu.dma_semaphore, #tpu.memory_space<semaphore_mem>>
    %8 = tpu.memref_squeeze %7 : memref<1x!tpu.dma_semaphore, #tpu.memory_space<semaphore_mem>> -> memref<!tpu.dma_semaphore, #tpu.memory_space<semaphore_mem>>
    tpu.enqueue_dma source(%6 : memref<9x9x128xf32, #tpu.memory_space<any>>) target(%arg10 : memref<9x9x128xf32, #tpu.memory_space<vmem>>) target_semaphore(%8 : memref<!tpu.dma_semaphore, #tpu.memory_space<semaphore_mem>>)
    %c0 = arith.constant 0 : index
    %c0_4 = arith.constant 0 : index
    %c0_5 = arith.constant 0 : index
    %c0_6 = arith.constant 0 : index
    %9 = vector.load %arg4[%c0, %c0_4, %c0_5, %c0_6] : memref<1x8x9x128xf32, #tpu.memory_space<vmem>>, vector<1x8x8x128xf32>
    %10 = vector.shape_cast %9 : vector<1x8x8x128xf32> to vector<8x8x128xf32>
    %c0_7 = arith.constant 0 : index
    %c0_8 = arith.constant 0 : index
    %c384 = arith.constant 384 : index
    %11 = vector.load %arg11[%c0_7, %c0_8, %c384] : memref<8x8x1152xf32, #tpu.memory_space<vmem>>, vector<8x8x128xf32>
    tpu.vector_store %arg11[%c0_7, %c0_8, %c384], %10 {strides = array<i32>} : memref<8x8x1152xf32, #tpu.memory_space<vmem>>, vector<8x8x128xf32>,
    %c0_9 = arith.constant 0 : index
    %c0_10 = arith.constant 0 : index
    %c0_11 = arith.constant 0 : index
    %c0_12 = arith.constant 0 : index
    %12 = vector.load %arg5[%c0_9, %c0_10, %c0_11, %c0_12] : memref<1x8x9x128xf32, #tpu.memory_space<vmem>>, vector<1x8x8x128xf32>
    %13 = vector.shape_cast %12 : vector<1x8x8x128xf32> to vector<8x8x128xf32>
    %c0_13 = arith.constant 0 : index
    %c0_14 = arith.constant 0 : index
    %c512 = arith.constant 512 : index
    %14 = vector.load %arg11[%c0_13, %c0_14, %c512] : memref<8x8x1152xf32, #tpu.memory_space<vmem>>, vector<8x8x128xf32>
    tpu.vector_store %arg11[%c0_13, %c0_14, %c512], %13 {strides = array<i32>} : memref<8x8x1152xf32, #tpu.memory_space<vmem>>, vector<8x8x128xf32>,
    %c0_15 = arith.constant 0 : index
    %c0_16 = arith.constant 0 : index
    %c1 = arith.constant 1 : index
    %c0_17 = arith.constant 0 : index
    %15 = vector.load %arg4[%c0_15, %c0_16, %c1, %c0_17] : memref<1x8x9x128xf32, #tpu.memory_space<vmem>>, vector<1x8x8x128xf32>
    %16 = vector.shape_cast %15 : vector<1x8x8x128xf32> to vector<8x8x128xf32>
    %c0_18 = arith.constant 0 : index
    %c0_19 = arith.constant 0 : index
    %c640 = arith.constant 640 : index
    %17 = vector.load %arg11[%c0_18, %c0_19, %c640] : memref<8x8x1152xf32, #tpu.memory_space<vmem>>, vector<8x8x128xf32>
    tpu.vector_store %arg11[%c0_18, %c0_19, %c640], %16 {strides = array<i32>} : memref<8x8x1152xf32, #tpu.memory_space<vmem>>, vector<8x8x128xf32>,
    %c0_i32_20 = arith.constant 0 : i32
    %c0_i32_21 = arith.constant 0 : i32
    %c0_i32_22 = arith.constant 0 : i32
    %18 = tpu.memref_slice %arg2[%arg0, %0, %c0_i32_21, %c0_i32_22] : memref<2x9x9x128xf32, #tpu.memory_space<any>> -> memref<1x9x9x128xf32, #tpu.memory_space<any>>
    %19 = tpu.memref_squeeze %18 : memref<1x9x9x128xf32, #tpu.memory_space<any>> -> memref<9x9x128xf32, #tpu.memory_space<any>>
    %20 = tpu.memref_slice %arg12[%c0_i32_20] : memref<2x!tpu.dma_semaphore, #tpu.memory_space<semaphore_mem>> -> memref<1x!tpu.dma_semaphore, #tpu.memory_space<semaphore_mem>>
    %21 = tpu.memref_squeeze %20 : memref<1x!tpu.dma_semaphore, #tpu.memory_space<semaphore_mem>> -> memref<!tpu.dma_semaphore, #tpu.memory_space<semaphore_mem>>
    tpu.wait_dma2 semaphore(%21 : memref<!tpu.dma_semaphore, #tpu.memory_space<semaphore_mem>>) src(%19 : memref<9x9x128xf32, #tpu.memory_space<any>>) dst(%arg9 : memref<9x9x128xf32, #tpu.memory_space<vmem>>)
    %c1_i32_23 = arith.constant 1 : i32
    %c0_i32_24 = arith.constant 0 : i32
    %c0_i32_25 = arith.constant 0 : i32
    %22 = tpu.memref_slice %arg3[%arg0, %0, %c0_i32_24, %c0_i32_25] : memref<2x9x9x128xf32, #tpu.memory_space<any>> -> memref<1x9x9x128xf32, #tpu.memory_space<any>>
    %23 = tpu.memref_squeeze %22 : memref<1x9x9x128xf32, #tpu.memory_space<any>> -> memref<9x9x128xf32, #tpu.memory_space<any>>
    %24 = tpu.memref_slice %arg12[%c1_i32_23] : memref<2x!tpu.dma_semaphore, #tpu.memory_space<semaphore_mem>> -> memref<1x!tpu.dma_semaphore, #tpu.memory_space<semaphore_mem>>
    %25 = tpu.memref_squeeze %24 : memref<1x!tpu.dma_semaphore, #tpu.memory_space<semaphore_mem>> -> memref<!tpu.dma_semaphore, #tpu.memory_space<semaphore_mem>>
    tpu.wait_dma2 semaphore(%25 : memref<!tpu.dma_semaphore, #tpu.memory_space<semaphore_mem>>) src(%23 : memref<9x9x128xf32, #tpu.memory_space<any>>) dst(%arg10 : memref<9x9x128xf32, #tpu.memory_space<vmem>>)
    %c0_26 = arith.constant 0 : index
    %c0_27 = arith.constant 0 : index
    %c0_28 = arith.constant 0 : index
    %26 = vector.load %arg9[%c0_26, %c0_27, %c0_28] : memref<9x9x128xf32, #tpu.memory_space<vmem>>, vector<8x8x128xf32>
    %c0_29 = arith.constant 0 : index
    %c0_30 = arith.constant 0 : index
    %c0_31 = arith.constant 0 : index
    %27 = vector.load %arg11[%c0_29, %c0_30, %c0_31] : memref<8x8x1152xf32, #tpu.memory_space<vmem>>, vector<8x8x128xf32>
    tpu.vector_store %arg11[%c0_29, %c0_30, %c0_31], %26 {strides = array<i32>} : memref<8x8x1152xf32, #tpu.memory_space<vmem>>, vector<8x8x128xf32>,
    %c0_32 = arith.constant 0 : index
    %c0_33 = arith.constant 0 : index
    %c0_34 = arith.constant 0 : index
    %28 = vector.load %arg10[%c0_32, %c0_33, %c0_34] : memref<9x9x128xf32, #tpu.memory_space<vmem>>, vector<8x8x128xf32>
    %c0_35 = arith.constant 0 : index
    %c0_36 = arith.constant 0 : index
    %c128 = arith.constant 128 : index
    %29 = vector.load %arg11[%c0_35, %c0_36, %c128] : memref<8x8x1152xf32, #tpu.memory_space<vmem>>, vector<8x8x128xf32>
    tpu.vector_store %arg11[%c0_35, %c0_36, %c128], %28 {strides = array<i32>} : memref<8x8x1152xf32, #tpu.memory_space<vmem>>, vector<8x8x128xf32>,
    %c0_37 = arith.constant 0 : index
    %c1_38 = arith.constant 1 : index
    %c0_39 = arith.constant 0 : index
    %30 = vector.load %arg9[%c0_37, %c1_38, %c0_39] : memref<9x9x128xf32, #tpu.memory_space<vmem>>, vector<8x8x128xf32>
    %c0_40 = arith.constant 0 : index
    %c0_41 = arith.constant 0 : index
    %c256 = arith.constant 256 : index
    %31 = vector.load %arg11[%c0_40, %c0_41, %c256] : memref<8x8x1152xf32, #tpu.memory_space<vmem>>, vector<8x8x128xf32>
    tpu.vector_store %arg11[%c0_40, %c0_41, %c256], %30 {strides = array<i32>} : memref<8x8x1152xf32, #tpu.memory_space<vmem>>, vector<8x8x128xf32>,
    %c1_42 = arith.constant 1 : index
    %c0_43 = arith.constant 0 : index
    %c0_44 = arith.constant 0 : index
    %32 = vector.load %arg9[%c1_42, %c0_43, %c0_44] : memref<9x9x128xf32, #tpu.memory_space<vmem>>, vector<8x8x128xf32>
    %c0_45 = arith.constant 0 : index
    %c0_46 = arith.constant 0 : index
    %c768 = arith.constant 768 : index
    %33 = vector.load %arg11[%c0_45, %c0_46, %c768] : memref<8x8x1152xf32, #tpu.memory_space<vmem>>, vector<8x8x128xf32>
    tpu.vector_store %arg11[%c0_45, %c0_46, %c768], %32 {strides = array<i32>} : memref<8x8x1152xf32, #tpu.memory_space<vmem>>, vector<8x8x128xf32>,
    %c1_47 = arith.constant 1 : index
    %c0_48 = arith.constant 0 : index
    %c0_49 = arith.constant 0 : index
    %34 = vector.load %arg10[%c1_47, %c0_48, %c0_49] : memref<9x9x128xf32, #tpu.memory_space<vmem>>, vector<8x8x128xf32>
    %c0_50 = arith.constant 0 : index
    %c0_51 = arith.constant 0 : index
    %c896 = arith.constant 896 : index
    %35 = vector.load %arg11[%c0_50, %c0_51, %c896] : memref<8x8x1152xf32, #tpu.memory_space<vmem>>, vector<8x8x128xf32>
    tpu.vector_store %arg11[%c0_50, %c0_51, %c896], %34 {strides = array<i32>} : memref<8x8x1152xf32, #tpu.memory_space<vmem>>, vector<8x8x128xf32>,
    %c1_52 = arith.constant 1 : index
    %c1_53 = arith.constant 1 : index
    %c0_54 = arith.constant 0 : index
    %36 = vector.load %arg9[%c1_52, %c1_53, %c0_54] : memref<9x9x128xf32, #tpu.memory_space<vmem>>, vector<8x8x128xf32>
    %c0_55 = arith.constant 0 : index
    %c0_56 = arith.constant 0 : index
    %c1024 = arith.constant 1024 : index
    %37 = vector.load %arg11[%c0_55, %c0_56, %c1024] : memref<8x8x1152xf32, #tpu.memory_space<vmem>>, vector<8x8x128xf32>
    tpu.vector_store %arg11[%c0_55, %c0_56, %c1024], %36 {strides = array<i32>} : memref<8x8x1152xf32, #tpu.memory_space<vmem>>, vector<8x8x128xf32>,
    %c0_57 = arith.constant 0 : index
    %c0_58 = arith.constant 0 : index
    %c0_59 = arith.constant 0 : index
    %38 = vector.load %arg11[%c0_57, %c0_58, %c0_59] : memref<8x8x1152xf32, #tpu.memory_space<vmem>>, vector<8x8x1152xf32>
    %39 = vector.shape_cast %38 : vector<8x8x1152xf32> to vector<64x1152xf32>
    %c0_60 = arith.constant 0 : index
    %c0_61 = arith.constant 0 : index
    %40 = vector.load %arg6[%c0_60, %c0_61] : memref<1152x128xf32, #tpu.memory_space<vmem>>, vector<1152x128xf32>
    %cst = arith.constant dense<0.000000e+00> : vector<64x128xf32>
    %41 = tpu.matmul %39, %40, %cst {dimension_numbers = #tpu.dot_dimension_numbers<[1], [0], [0], [1], [0, 0, 1, 1], [], []>} : vector<64x1152xf32>, vector<1152x128xf32>, vector<64x128xf32> -> vector<64x128xf32>
    %c0_62 = arith.constant 0 : index
    %c0_63 = arith.constant 0 : index
    %42 = vector.load %arg7[%c0_62, %c0_63] : memref<1x128xf32, #tpu.memory_space<vmem>>, vector<1x128xf32>
    %43 = vector.broadcast %42 : vector<1x128xf32> to vector<64x128xf32>
    %44 = arith.addf %41, %43 : vector<64x128xf32>
    %c0_64 = arith.constant 0 : index
    %c0_65 = arith.constant 0 : index
    %c0_66 = arith.constant 0 : index
    %45 = vector.load %arg8[%c0_64, %c0_65, %c0_66] : memref<1x64x128xf32, #tpu.memory_space<vmem>>, vector<1x64x128xf32>
    %46 = vector.shape_cast %45 : vector<1x64x128xf32> to vector<64x128xf32>
    %47 = vector.shape_cast %44 : vector<64x128xf32> to vector<1x64x128xf32>
    tpu.vector_store %arg8[%c0_64, %c0_65, %c0_66], %47 {strides = array<i32>} : memref<1x64x128xf32, #tpu.memory_space<vmem>>, vector<1x64x128xf32>,
    return
  }
  func.func @transform_2(%arg0: i32, %arg1: i32) -> (i32, i32, i32, i32) {
    %c0_i32 = arith.constant 0 : i32
    %c0_i32_0 = arith.constant 0 : i32
    %c0_i32_1 = arith.constant 0 : i32
    return %arg0, %arg1, %c0_i32, %c0_i32_0 : i32, i32, i32, i32
  }
  func.func @transform_3(%arg0: i32, %arg1: i32) -> (i32, i32, i32, i32) {
    %c0_i32 = arith.constant 0 : i32
    %c0_i32_0 = arith.constant 0 : i32
    %c0_i32_1 = arith.constant 0 : i32
    return %arg0, %arg1, %c0_i32, %c0_i32_0 : i32, i32, i32, i32
  }
  func.func @transform_4(%arg0: i32, %arg1: i32) -> (i32, i32) {
    %c0_i32 = arith.constant 0 : i32
    %c0_i32_0 = arith.constant 0 : i32
    %c0_i32_1 = arith.constant 0 : i32
    return %c0_i32, %c0_i32_0 : i32, i32
  }
  func.func @transform_5(%arg0: i32, %arg1: i32) -> (i32, i32) {
    %c0_i32 = arith.constant 0 : i32
    %c0_i32_0 = arith.constant 0 : i32
    %c0_i32_1 = arith.constant 0 : i32
    return %c0_i32, %c0_i32_0 : i32, i32
  }
  func.func @transform_6(%arg0: i32, %arg1: i32) -> (i32, i32, i32) {
    %c0_i32 = arith.constant 0 : i32
    %c0_i32_0 = arith.constant 0 : i32
    return %arg0, %arg1, %c0_i32 : i32, i32, i32
  }
}

</mosaic_0001>

<bundles_post_ra>
// kernel: downsample_pallas.1
= control target key start
LH: loop header
LB: loop body
LE: loop exit
PB: predicated region body
PF: predicated region fallthrough
CT: control target
= control target key end

     0   :  { %s2152_s21 = smov 0   ;;  %s2154_s22 = smov 0   ;;  %s2849_s0 = inlined_call_operand.vmem [shape: f32[2,9,9,128], index: 0, kind: input, shape index: {}]   ;;  %s2850_s1 = inlined_call_operand.vmem [shape: f32[2,9,9,128], index: 1, kind: input, shape index: {}]   ;;  %s2851_s2 = inlined_call_operand.vmem [shape: f32[2,8,9,128], index: 2, kind: input, shape index: {}]   ;;  %s2852_s3 = inlined_call_operand.vmem [shape: f32[2,8,9,128], index: 3, kind: input, shape index: {}]   ;;  %s2853_s4 = inlined_call_operand.vmem [shape: f32[1152,128], index: 4, kind: input, shape index: {}]   ;;  %s2854_s5 = inlined_call_operand.vmem [shape: f32[1,128], index: 5, kind: input, shape index: {}]   ;;  %s2855_s6 = inlined_call_operand.vmem [shape: f32[2,64,128], index: 6, kind: output, shape index: {}]  }
   0x1   :  { %s2156_s23 = smov 0  }
   0x2 LB: > { %s28_s24 = sadd.s32 1, %s2111_s22  ;;  %p1564_p0 = scmp.ge.s32.totalorder %s2115_s23, 1  ;;  %s2115_s23 = sphi %s2156_s23, %s16_s23   ;;  %s2111_s22 = sphi %s2154_s22, %s2857_s22   ;;  %s2107_s21 = sphi %s2152_s21, %s2856_s21  }
   0x3   : > { %p30_p1 = scmp.ge.s32.totalorder %s28_s24, 2  ;;  %p204_p2 = scmp.lt.s32.totalorder %s2115_s23, 3 }
   0x5   : > { %s2859_s24 = smov (%p30_p1, %s28_s24), 0  ;;  %p205_p3 = pnand %p1564_p0, %p204_p2 }
   0x6   : > { %p250_p4 = scmp.lt.s32.totalorder (!%p205_p3), %s2107_s21, 1  ;;  %s283_s25 = smul.u32 (!%p205_p3), 144, %s2107_s21 }
   0x7   : > { %208 = sbr.rel (%p205_p3) target bundleno = 364 (0x16c), region = 36 }
   0x8   : > { %s2180_s29 = scalar_lea.vmem (!%p205_p3), %s2849_s0, %s283_s25 }
   0x9   : > { %v339_v0 = vld [vmem:[%s2180_s29] sm:$0xff] (!%p205_p3)  ;;  %v341_v1 = vld [vmem:[%s2180_s29 + $0x10] sm:$0xff] (!%p205_p3)  ;;  %v1571_v9 = vld [vmem:[%s2180_s29 + $0x8] sm:$0x1] (!%p205_p3) }
   0xa   : > { %v343_v2 = vld [vmem:[%s2180_s29 + $0x20] sm:$0xff] (!%p205_p3)  ;;  %340 = vst [vmem:[#allocation2] sm:$0xff] (!%p205_p3), %v339_v0  ;;  %342 = vst [vmem:[#allocation2 + $0x10] sm:$0xff] (!%p205_p3), %v341_v1  ;;  %v345_v3 = vld [vmem:[%s2180_s29 + $0x30] sm:$0xff] (!%p205_p3) }
   0xb   : > { %344 = vst [vmem:[#allocation2 + $0x20] sm:$0xff] (!%p205_p3), %v343_v2  ;;  %v347_v4 = vld [vmem:[%s2180_s29 + $0x40] sm:$0xff] (!%p205_p3)  ;;  %v349_v5 = vld [vmem:[%s2180_s29 + $0x50] sm:$0xff] (!%p205_p3)  ;;  %346 = vst [vmem:[#allocation2 + $0x30] sm:$0xff] (!%p205_p3), %v345_v3 }
   0xc   : > { %348 = vst [vmem:[#allocation2 + $0x40] sm:$0xff] (!%p205_p3), %v347_v4  ;;  %350 = vst [vmem:[#allocation2 + $0x50] sm:$0xff] (!%p205_p3), %v349_v5  ;;  %v351_v6 = vld [vmem:[%s2180_s29 + $0x60] sm:$0xff] (!%p205_p3)  ;;  %v353_v7 = vld [vmem:[%s2180_s29 + $0x70] sm:$0xff] (!%p205_p3) }
   0xd   : > { %v355_v8 = vld [vmem:[%s2180_s29 + $0x80] sm:$0xff] (!%p205_p3)  ;;  %352 = vst [vmem:[#allocation2 + $0x60] sm:$0xff] (!%p205_p3), %v351_v6  ;;  %354 = vst [vmem:[#allocation2 + $0x70] sm:$0xff] (!%p205_p3), %v353_v7  ;;  %v1572_v10 = vld [vmem:[%s2180_s29 + $0x18] sm:$0x1] (!%p205_p3) }
   0xe   : > { %s251_s26 = scalar_select %p250_p4, %s2107_s21, 1  ;;  %356 = vst [vmem:[#allocation2 + $0x80] sm:$0xff] %v355_v8  ;;  %v1573_v11 = vld [vmem:[%s2180_s29 + $0x28] sm:$0x1]  ;;  %367 = vst [vmem:[#allocation2 + $0x8] sm:$0x1] %v1571_v9 }
   0xf   : > { %369 = vst [vmem:[#allocation2 + $0x18] sm:$0x1] %v1572_v10  ;;  %371 = vst [vmem:[#allocation2 + $0x28] sm:$0x1] %v1573_v11  ;;  %v1574_v12 = vld [vmem:[%s2180_s29 + $0x38] sm:$0x1] }
  0x10   : > { %s1594_s30 = sshll.u32 %s251_s26, 7  ;;  %s1596_s7 = sshll.u32 %s251_s26, 6  ;;  %v1575_v13 = vld [vmem:[%s2180_s29 + $0x48] sm:$0x1]  ;;  %v1576_v14 = vld [vmem:[%s2180_s29 + $0x58] sm:$0x1] }
  0x11   : > { %s2188_s10 = scalar_lea.vmem %s2851_s2, %s1594_s30  ;;  %s2193_s13 = scalar_lea.vmem %s2852_s3, %s1594_s30  ;;  %373 = vst [vmem:[#allocation2 + $0x38] sm:$0x1] %v1574_v12  ;;  %375 = vst [vmem:[#allocation2 + $0x48] sm:$0x1] %v1575_v13  ;;  %v1577_v15 = vld [vmem:[%s2180_s29 + $0x68] sm:$0x1] }
  0x12   : > { %s2201_s16 = scalar_lea.vmem %s2855_s6, %s1596_s7  ;;  %377 = vst [vmem:[#allocation2 + $0x58] sm:$0x1] %v1576_v14  ;;  %v1578_v16 = vld [vmem:[%s2180_s29 + $0x78] sm:$0x1]  ;;  %v1579_v17 = vld [vmem:[%s2180_s29 + $0x88] sm:$0x1] }
  0x13   : > { %379 = vst [vmem:[#allocation2 + $0x68] sm:$0x1] %v1577_v15  ;;  %381 = vst [vmem:[#allocation2 + $0x78] sm:$0x1] %v1578_v16 }
  0x14   : > { %383 = vst [vmem:[#allocation2 + $0x88] sm:$0x1] %v1579_v17 }
  0x15   : > { %387 = vsyncadd [#allocation5], 1296  ;;  %s388_s19 = scalar_lea.vmem %s2850_s1, %s283_s25 }
  0x16   : > { %v443_v18 = vld [vmem:[%s388_s19] sm:$0xff]  ;;  %v445_v19 = vld [vmem:[%s388_s19 + $0x10] sm:$0xff] }
  0x17   : > { %v447_v20 = vld [vmem:[%s388_s19 + $0x20] sm:$0xff]  ;;  %444 = vst [vmem:[#allocation3] sm:$0xff] %v443_v18  ;;  %446 = vst [vmem:[#allocation3 + $0x10] sm:$0xff] %v445_v19  ;;  %v449_v21 = vld [vmem:[%s388_s19 + $0x30] sm:$0xff] }
  0x18   : > { %448 = vst [vmem:[#allocation3 + $0x20] sm:$0xff] %v447_v20  ;;  %v451_v22 = vld [vmem:[%s388_s19 + $0x40] sm:$0xff]  ;;  %v453_v23 = vld [vmem:[%s388_s19 + $0x50] sm:$0xff]  ;;  %450 = vst [vmem:[#allocation3 + $0x30] sm:$0xff] %v449_v21 }
  0x19   : > { %452 = vst [vmem:[#allocation3 + $0x40] sm:$0xff] %v451_v22  ;;  %454 = vst [vmem:[#allocation3 + $0x50] sm:$0xff] %v453_v23  ;;  %v455_v24 = vld [vmem:[%s388_s19 + $0x60] sm:$0xff]  ;;  %v457_v25 = vld [vmem:[%s388_s19 + $0x70] sm:$0xff] }
  0x1a   : > { %v459_v26 = vld [vmem:[%s388_s19 + $0x80] sm:$0xff]  ;;  %456 = vst [vmem:[#allocation3 + $0x60] sm:$0xff] %v455_v24  ;;  %458 = vst [vmem:[#allocation3 + $0x70] sm:$0xff] %v457_v25 }
  0x1b   : > { %460 = vst [vmem:[#allocation3 + $0x80] sm:$0xff] %v459_v26 }
  0x1c   : > { %491 = vsyncadd [#allocation5 + $0x1], 1296  ;;  %v492_v27 = vld [vmem:[%s2188_s10] sm:$0xff]  ;;  %v2222_v28 = vld [vmem:[%s2188_s10 + $0x10] sm:$0xff] }
  0x1d   : > { %v2225_v29 = vld [vmem:[%s2188_s10 + $0x20] sm:$0xff]  ;;  %v2228_v30 = vld [vmem:[%s2188_s10 + $0x30] sm:$0xff] }
  0x1e   : > { %v2231_v31 = vld [vmem:[%s2188_s10 + $0x40] sm:$0xff]  ;;  %v2234_v32 = vld [vmem:[%s2188_s10 + $0x50] sm:$0xff] }
  0x1f   : > { %v2237_v33 = vld [vmem:[%s2188_s10 + $0x60] sm:$0xff]  ;;  %v2240_v34 = vld [vmem:[%s2188_s10 + $0x70] sm:$0xff] }
  0x20   : > { %v2243_v35 = vld [vmem:[%s2193_s13] sm:$0xff]  ;;  %v2246_v36 = vld [vmem:[%s2193_s13 + $0x10] sm:$0xff] }
  0x21   : > { %v2249_v37 = vld [vmem:[%s2193_s13 + $0x20] sm:$0xff]  ;;  %v2252_v38 = vld [vmem:[%s2193_s13 + $0x30] sm:$0xff] }
  0x22   : > { %v2255_v39 = vld [vmem:[%s2193_s13 + $0x40] sm:$0xff]  ;;  %v2258_v40 = vld [vmem:[%s2193_s13 + $0x50] sm:$0xff] }
  0x23   : > { %v2261_v41 = vld [vmem:[%s2193_s13 + $0x60] sm:$0xff]  ;;  %v2264_v42 = vld [vmem:[%s2193_s13 + $0x70] sm:$0xff] }
  0x24   : > { %v2267_v43 = vld [vmem:[%s2188_s10 + $0x1] sm:$0xff]  ;;  %v2270_v44 = vld [vmem:[%s2188_s10 + $0x11] sm:$0xff] }
  0x25   : > { %v2273_v45 = vld [vmem:[%s2188_s10 + $0x21] sm:$0xff]  ;;  %v2276_v46 = vld [vmem:[%s2188_s10 + $0x31] sm:$0xff] }
  0x26   : > { %v2279_v47 = vld [vmem:[%s2188_s10 + $0x41] sm:$0xff]  ;;  %v2282_v48 = vld [vmem:[%s2188_s10 + $0x51] sm:$0xff] }
  0x27   : > { %v2285_v49 = vld [vmem:[%s2188_s10 + $0x61] sm:$0xff]  ;;  %v2288_v50 = vld [vmem:[%s2188_s10 + $0x71] sm:$0xff] }
  0x28   : > { %2101 = dma.done.wait [#allocation5], 1296 }
  0x29   : > { %2102 = vsyncadd [#allocation5], 4294966000 }
  0x2a   : > { %2103 = dma.done.wait [#allocation5 + $0x1], 1296 }
  0x2b   : > { %2104 = vsyncadd [#allocation5 + $0x1], 4294966000  ;;  %1036 = vmatprep.mubr.f32.mxu1 %v492_v27  ;;  %v732_v51 = vld [vmem:[%s2853_s4 + $0x80] sm:$0xff]  ;;  %v733_v52 = vld [vmem:[%s2853_s4 + $0x88] sm:$0xff] }
  0x2c   : > { %v764_v53 = vld [vmem:[%s2853_s4 + $0x180] sm:$0xff]  ;;  %v1889_v54 = vpack.c.bf16 %v733_v52, %v732_v51  ;;  %v765_v55 = vld [vmem:[%s2853_s4 + $0x188] sm:$0xff]  ;;  %v734_v62 = vld [vmem:[%s2853_s4 + $0x90] sm:$0xff] }
  0x2d   : > { %v716_v56 = vld [vmem:[%s2853_s4] sm:$0xff]  ;;  %v717_v57 = vld [vmem:[%s2853_s4 + $0x8] sm:$0xff]  ;;  %v1921_v58 = vpack.c.bf16 %v765_v55, %v764_v53  ;;  %v735_v0 = vld [vmem:[%s2853_s4 + $0x98] sm:$0xff] }
  0x2e   : > { %v1891_v59 = vpack.c.bf16 %v717_v57, %v716_v56  ;;  %v748_v60 = vld [vmem:[%s2853_s4 + $0x100] sm:$0xff]  ;;  %v749_v61 = vld [vmem:[%s2853_s4 + $0x108] sm:$0xff]  ;;  %1890 = vmatprep.subr.bf16.mxu0 %v1889_v54  ;;  %v766_v1 = vld [vmem:[%s2853_s4 + $0x190] sm:$0xff]  ;;  %v1893_v3 = vpack.c.bf16 %v735_v0, %v734_v62 }
  0x2f   : > { %v1923_v63 = vpack.c.bf16 %v749_v61, %v748_v60  ;;  %v767_v2 = vld [vmem:[%s2853_s4 + $0x198] sm:$0xff]  ;;  %1922 = vmatprep.subr.bf16.mxu1 %v1921_v58  ;;  %v718_v5 = vld [vmem:[%s2853_s4 + $0x10] sm:$0xff]  ;;  %v736_v10 = vld [vmem:[%s2853_s4 + $0xa0] sm:$0xff] }
  0x30   : > { %1892 = vmatpush3.bf16.msra.mxu0 %v1891_v59  ;;  %v1925_v4 = vpack.c.bf16 %v767_v2, %v766_v1  ;;  %v719_v6 = vld [vmem:[%s2853_s4 + $0x18] sm:$0xff]  ;;  %v750_v7 = vld [vmem:[%s2853_s4 + $0x110] sm:$0xff]  ;;  %v737_v11 = vld [vmem:[%s2853_s4 + $0xa8] sm:$0xff] }
  0x31   : > { %1924 = vmatpush3.bf16.msra.mxu1 %v1923_v63  ;;  %v1895_v8 = vpack.c.bf16 %v719_v6, %v718_v5  ;;  %v751_v9 = vld [vmem:[%s2853_s4 + $0x118] sm:$0xff]  ;;  %1894 = vmatprep.subr.bf16.mxu0 %v1893_v3  ;;  %v1897_v13 = vpack.c.bf16 %v737_v11, %v736_v10  ;;  %v768_v14 = vld [vmem:[%s2853_s4 + $0x1a0] sm:$0xff]  ;;  %v769_v15 = vld [vmem:[%s2853_s4 + $0x1a8] sm:$0xff] }
  0x32   : > { %1926 = vmatprep.subr.bf16.mxu1 %v1925_v4  ;;  %v1927_v12 = vpack.c.bf16 %v751_v9, %v750_v7  ;;  %v720_v16 = vld [vmem:[%s2853_s4 + $0x20] sm:$0xff]  ;;  %v1929_v17 = vpack.c.bf16 %v769_v15, %v768_v14  ;;  %v721_v18 = vld [vmem:[%s2853_s4 + $0x28] sm:$0xff]  ;;  %v738_v22 = vld [vmem:[%s2853_s4 + $0xb0] sm:$0xff] }
  0x33   : > { %v752_v19 = vld [vmem:[%s2853_s4 + $0x120] sm:$0xff]  ;;  %v753_v20 = vld [vmem:[%s2853_s4 + $0x128] sm:$0xff]  ;;  %v1899_v21 = vpack.c.bf16 %v721_v18, %v720_v16  ;;  %v739_v23 = vld [vmem:[%s2853_s4 + $0xb8] sm:$0xff] }
  0x34   : > { %1896 = vmatpush3.bf16.msra.mxu0 %v1895_v8  ;;  %v770_v24 = vld [vmem:[%s2853_s4 + $0x1b0] sm:$0xff]  ;;  %v1931_v25 = vpack.c.bf16 %v753_v20, %v752_v19  ;;  %v1901_v26 = vpack.c.bf16 %v739_v23, %v738_v22  ;;  %v771_v27 = vld [vmem:[%s2853_s4 + $0x1b8] sm:$0xff]  ;;  %v740_v56 = vld [vmem:[%s2853_s4 + $0xc0] sm:$0xff] }
  0x35   : > { %1928 = vmatpush3.bf16.msra.mxu1 %v1927_v12  ;;  %1898 = vmatprep.subr.bf16.mxu0 %v1897_v13  ;;  %v722_v51 = vld [vmem:[%s2853_s4 + $0x30] sm:$0xff]  ;;  %v723_v52 = vld [vmem:[%s2853_s4 + $0x38] sm:$0xff]  ;;  %v1933_v53 = vpack.c.bf16 %v771_v27, %v770_v24  ;;  %v741_v57 = vld [vmem:[%s2853_s4 + $0xc8] sm:$0xff] }
  0x36   : > { %1930 = vmatprep.subr.bf16.mxu1 %v1929_v17  ;;  %v754_v54 = vld [vmem:[%s2853_s4 + $0x130] sm:$0xff]  ;;  %v755_v55 = vld [vmem:[%s2853_s4 + $0x138] sm:$0xff]  ;;  %v772_v58 = vld [vmem:[%s2853_s4 + $0x1c0] sm:$0xff]  ;;  %v1903_v60 = vpack.c.bf16 %v723_v52, %v722_v51  ;;  %v1905_v62 = vpack.c.bf16 %v741_v57, %v740_v56 }
  0x37   : > { %v773_v59 = vld [vmem:[%s2853_s4 + $0x1c8] sm:$0xff]  ;;  %v1935_v61 = vpack.c.bf16 %v755_v55, %v754_v54  ;;  %v724_v63 = vld [vmem:[%s2853_s4 + $0x40] sm:$0xff]  ;;  %v742_v4 = vld [vmem:[%s2853_s4 + $0xd0] sm:$0xff] }
  0x38   : > { %1900 = vmatpush3.bf16.msra.mxu0 %v1899_v21  ;;  %v725_v0 = vld [vmem:[%s2853_s4 + $0x48] sm:$0xff]  ;;  %v756_v1 = vld [vmem:[%s2853_s4 + $0x140] sm:$0xff]  ;;  %v1937_v2 = vpack.c.bf16 %v773_v59, %v772_v58  ;;  %v743_v5 = vld [vmem:[%s2853_s4 + $0xd8] sm:$0xff] }
  0x39   : > { %1932 = vmatpush3.bf16.msra.mxu1 %v1931_v25  ;;  %1902 = vmatprep.subr.bf16.mxu0 %v1901_v26  ;;  %v757_v3 = vld [vmem:[%s2853_s4 + $0x148] sm:$0xff]  ;;  %v774_v6 = vld [vmem:[%s2853_s4 + $0x1d0] sm:$0xff]  ;;  %v775_v7 = vld [vmem:[%s2853_s4 + $0x1d8] sm:$0xff]  ;;  %v1907_v8 = vpack.c.bf16 %v725_v0, %v724_v63  ;;  %v1909_v10 = vpack.c.bf16 %v743_v5, %v742_v4 }
  0x3a   : > { %1934 = vmatprep.subr.bf16.mxu1 %v1933_v53  ;;  %v1939_v9 = vpack.c.bf16 %v757_v3, %v756_v1  ;;  %v726_v11 = vld [vmem:[%s2853_s4 + $0x50] sm:$0xff]  ;;  %v727_v12 = vld [vmem:[%s2853_s4 + $0x58] sm:$0xff]  ;;  %v1941_v14 = vpack.c.bf16 %v775_v7, %v774_v6  ;;  %v744_v16 = vld [vmem:[%s2853_s4 + $0xe0] sm:$0xff] }
  0x3b   : > { %v758_v13 = vld [vmem:[%s2853_s4 + $0x150] sm:$0xff]  ;;  %v759_v15 = vld [vmem:[%s2853_s4 + $0x158] sm:$0xff]  ;;  %v745_v17 = vld [vmem:[%s2853_s4 + $0xe8] sm:$0xff]  ;;  %v1911_v20 = vpack.c.bf16 %v727_v12, %v726_v11 }
  0x3c   : > { %1904 = vmatpush3.bf16.msra.mxu0 %v1903_v60  ;;  %v776_v18 = vld [vmem:[%s2853_s4 + $0x1e0] sm:$0xff]  ;;  %v777_v19 = vld [vmem:[%s2853_s4 + $0x1e8] sm:$0xff]  ;;  %v1943_v22 = vpack.c.bf16 %v759_v15, %v758_v13  ;;  %v1913_v23 = vpack.c.bf16 %v745_v17, %v744_v16  ;;  %v562_v26 = vld [vmem:[#allocation3] sm:$0xff] }
  0x3d   : > { %1936 = vmatpush3.bf16.msra.mxu1 %v1935_v61  ;;  %1906 = vmatprep.subr.bf16.mxu0 %v1905_v62  ;;  %v728_v21 = vld [vmem:[%s2853_s4 + $0x60] sm:$0xff]  ;;  %v729_v24 = vld [vmem:[%s2853_s4 + $0x68] sm:$0xff]  ;;  %v1945_v27 = vpack.c.bf16 %v777_v19, %v776_v18  ;;  %v746_v52 = vld [vmem:[%s2853_s4 + $0xf0] sm:$0xff] }
  0x3e   : > { %1938 = vmatprep.subr.bf16.mxu1 %v1937_v2  ;;  %v760_v25 = vld [vmem:[%s2853_s4 + $0x160] sm:$0xff]  ;;  %v761_v51 = vld [vmem:[%s2853_s4 + $0x168] sm:$0xff]  ;;  %v747_v53 = vld [vmem:[%s2853_s4 + $0xf8] sm:$0xff]  ;;  %931 = vmatprep.mubr.f32.mxu0 %v562_v26  ;;  %v1915_v56 = vpack.c.bf16 %v729_v24, %v728_v21 }
  0x3f   : > { %v778_v54 = vld [vmem:[%s2853_s4 + $0x1f0] sm:$0xff]  ;;  %v779_v55 = vld [vmem:[%s2853_s4 + $0x1f8] sm:$0xff]  ;;  %v1947_v57 = vpack.c.bf16 %v761_v51, %v760_v25  ;;  %v1917_v58 = vpack.c.bf16 %v747_v53, %v746_v52  ;;  %v796_v0 = vld [vmem:[%s2853_s4 + $0x280] sm:$0xff] }
  0x40   : > { %1908 = vmatpush3.bf16.msra.mxu0 %v1907_v8  ;;  %v730_v59 = vld [vmem:[%s2853_s4 + $0x70] sm:$0xff]  ;;  %v731_v60 = vld [vmem:[%s2853_s4 + $0x78] sm:$0xff]  ;;  %v1949_v62 = vpack.c.bf16 %v779_v55, %v778_v54  ;;  %v797_v1 = vld [vmem:[%s2853_s4 + $0x288] sm:$0xff] }
  0x41   : > { %1940 = vmatpush3.bf16.msra.mxu1 %v1939_v9  ;;  %1910 = vmatprep.subr.bf16.mxu0 %v1909_v10  ;;  %v762_v61 = vld [vmem:[%s2853_s4 + $0x170] sm:$0xff]  ;;  %v763_v63 = vld [vmem:[%s2853_s4 + $0x178] sm:$0xff]  ;;  %v828_v2 = vld [vmem:[%s2853_s4 + $0x380] sm:$0xff]  ;;  %v1919_v4 = vpack.c.bf16 %v731_v60, %v730_v59  ;;  %v1953_v6 = vpack.c.bf16 %v797_v1, %v796_v0 }
  0x42   : > { %1942 = vmatprep.subr.bf16.mxu1 %v1941_v14  ;;  %v829_v3 = vld [vmem:[%s2853_s4 + $0x388] sm:$0xff]  ;;  %v1951_v5 = vpack.c.bf16 %v763_v63, %v762_v61  ;;  %v780_v7 = vld [vmem:[%s2853_s4 + $0x200] sm:$0xff]  ;;  %v798_v12 = vld [vmem:[%s2853_s4 + $0x290] sm:$0xff] }
  0x43   : > { %v781_v8 = vld [vmem:[%s2853_s4 + $0x208] sm:$0xff]  ;;  %v1985_v9 = vpack.c.bf16 %v829_v3, %v828_v2  ;;  %v812_v10 = vld [vmem:[%s2853_s4 + $0x300] sm:$0xff]  ;;  %v799_v13 = vld [vmem:[%s2853_s4 + $0x298] sm:$0xff] }
  0x44   : > { %1912 = vmatpush3.bf16.msra.mxu0 %v1911_v20  ;;  %v813_v11 = vld [vmem:[%s2853_s4 + $0x308] sm:$0xff]  ;;  %v546_v14 = vld [vmem:[#allocation2] sm:$0xff]  ;;  %v1955_v15 = vpack.c.bf16 %v781_v8, %v780_v7  ;;  %v830_v16 = vld [vmem:[%s2853_s4 + $0x390] sm:$0xff] }
  0x45   : > { %1944 = vmatpush3.bf16.msra.mxu1 %v1943_v22  ;;  %1914 = vmatprep.subr.bf16.mxu0 %v1913_v23  ;;  %v831_v17 = vld [vmem:[%s2853_s4 + $0x398] sm:$0xff]  ;;  %v578_v18 = vld [vmem:[#allocation2 + $0x1] sm:$0xff]  ;;  %v1987_v19 = vpack.c.bf16 %v813_v11, %v812_v10  ;;  %v782_v20 = vld [vmem:[%s2853_s4 + $0x210] sm:$0xff]  ;;  %v1957_v23 = vpack.c.bf16 %v799_v13, %v798_v12 }
  0x46   : > { %1946 = vmatprep.subr.bf16.mxu1 %v1945_v27  ;;  %v783_v21 = vld [vmem:[%s2853_s4 + $0x218] sm:$0xff]  ;;  %v2524_v22 = vld [vmem:[#allocation3 + $0x10] sm:$0xff]  ;;  %v814_v24 = vld [vmem:[%s2853_s4 + $0x310] sm:$0xff]  ;;  %v1989_v26 = vpack.c.bf16 %v831_v17, %v830_v16 }
  0x47   : > { %v815_v25 = vld [vmem:[%s2853_s4 + $0x318] sm:$0xff]  ;;  %v800_v27 = vld [vmem:[%s2853_s4 + $0x2a0] sm:$0xff]  ;;  %v801_v51 = vld [vmem:[%s2853_s4 + $0x2a8] sm:$0xff]  ;;  %v1959_v53 = vpack.c.bf16 %v783_v21, %v782_v20 }
  0x48   : > { %1916 = vmatpush3.bf16.msra.mxu0 %v1915_v56  ;;  %v2538_v52 = vld [vmem:[#allocation2 + $0x10] sm:$0xff]  ;;  %v832_v54 = vld [vmem:[%s2853_s4 + $0x3a0] sm:$0xff]  ;;  %v833_v55 = vld [vmem:[%s2853_s4 + $0x3a8] sm:$0xff]  ;;  %v1961_v61 = vpack.c.bf16 %v801_v51, %v800_v27 }
  0x49   : > { %1948 = vmatpush3.bf16.msra.mxu1 %v1947_v57  ;;  %1918 = vmatprep.subr.bf16.mxu0 %v1917_v58  ;;  %v2547_v56 = vld [vmem:[#allocation2 + $0x11] sm:$0xff]  ;;  %v1991_v57 = vpack.c.bf16 %v815_v25, %v814_v24  ;;  %v784_v58 = vld [vmem:[%s2853_s4 + $0x220] sm:$0xff]  ;;  %v785_v59 = vld [vmem:[%s2853_s4 + $0x228] sm:$0xff]  ;;  %v1993_v0 = vpack.c.bf16 %v833_v55, %v832_v54 }
  0x4a   : > { %1950 = vmatprep.subr.bf16.mxu1 %v1949_v62  ;;  %v2556_v60 = vld [vmem:[#allocation3 + $0x20] sm:$0xff]  ;;  %v816_v62 = vld [vmem:[%s2853_s4 + $0x320] sm:$0xff]  ;;  %v817_v63 = vld [vmem:[%s2853_s4 + $0x328] sm:$0xff]  ;;  %v1963_v3 = vpack.c.bf16 %v785_v59, %v784_v58 }
  0x4b   : > { %v803_v1 = vld [vmem:[%s2853_s4 + $0x2b8] sm:$0xff]  ;;  %v2572_v2 = vld [vmem:[#allocation2 + $0x20] sm:$0xff]  ;;  %v1995_v7 = vpack.c.bf16 %v817_v63, %v816_v62  ;;  %v786_v8 = vld [vmem:[%s2853_s4 + $0x230] sm:$0xff] }
  0x4c   : > { %1920 = vmatpush3.bf16.msra.mxu0 %v1919_v4  ;;  %v834_v4 = vld [vmem:[%s2853_s4 + $0x3b0] sm:$0xff]  ;;  %v2590_v10 = vld [vmem:[#allocation3 + $0x30] sm:$0xff]  ;;  %v819_v13 = vld [vmem:[%s2853_s4 + $0x338] sm:$0xff] }
  0x4d   : > { %1952 = vmatpush3.bf16.msra.mxu1 %v1951_v5  ;;  %1954 = vmatprep.subr.bf16.mxu0 %v1953_v6  ;;  %v835_v5 = vld [vmem:[%s2853_s4 + $0x3b8] sm:$0xff]  ;;  %v2581_v6 = vld [vmem:[#allocation2 + $0x21] sm:$0xff]  ;;  %v818_v12 = vld [vmem:[%s2853_s4 + $0x330] sm:$0xff] }
  0x4e   : > { %1986 = vmatprep.subr.bf16.mxu1 %v1985_v9  ;;  %v787_v9 = vld [vmem:[%s2853_s4 + $0x238] sm:$0xff]  ;;  %v2606_v16 = vld [vmem:[#allocation2 + $0x30] sm:$0xff]  ;;  %v1999_v21 = vpack.c.bf16 %v819_v13, %v818_v12  ;;  %v789_v24 = vld [vmem:[%s2853_s4 + $0x248] sm:$0xff] }
  0x4f   : > { %932 = vmatmul.mubr.f32.vlgmr.msra.gmra.mrb[0].mxu0 %v546_v14  ;;  %v1997_v14 = vpack.c.bf16 %v835_v5, %v834_v4  ;;  %v1967_v17 = vpack.c.bf16 %v787_v9, %v786_v8  ;;  %v2615_v20 = vld [vmem:[#allocation2 + $0x31] sm:$0xff]  ;;  %v820_v27 = vld [vmem:[%s2853_s4 + $0x340] sm:$0xff]  ;;  %v821_v51 = vld [vmem:[%s2853_s4 + $0x348] sm:$0xff] }
  0x50   : > { %1037 = vmatmul.mubr.f32.vlgmr.msra.gmra.mrb[0].mxu1 %v578_v18  ;;  %1956 = vmatpush3.bf16.msra.mxu0 %v1955_v15  ;;  %v805_v15 = vld [vmem:[%s2853_s4 + $0x2c8] sm:$0xff]  ;;  %v836_v18 = vld [vmem:[%s2853_s4 + $0x3c0] sm:$0xff]  ;;  %v2624_v25 = vld [vmem:[#allocation3 + $0x40] sm:$0xff]  ;;  %v2003_v62 = vpack.c.bf16 %v821_v51, %v820_v27 }
  0x51   : > { %1988 = vmatpush3.bf16.msra.mxu1 %v1987_v19  ;;  %936 = vmatprep.mubr.f32.mxu0 %v2524_v22  ;;  %v837_v19 = vld [vmem:[%s2853_s4 + $0x3c8] sm:$0xff]  ;;  %v807_v54 = vld [vmem:[%s2853_s4 + $0x2d8] sm:$0xff]  ;;  %v2640_v55 = vld [vmem:[#allocation2 + $0x40] sm:$0xff] }
  0x52   : > { %1041 = vmatprep.mubr.f32.mxu1 %v2222_v28  ;;  %1958 = vmatprep.subr.bf16.mxu0 %v1957_v23  ;;  %v802_v28 = vld [vmem:[%s2853_s4 + $0x2b0] sm:$0xff]  ;;  %v788_v23 = vld [vmem:[%s2853_s4 + $0x240] sm:$0xff]  ;;  %v839_v59 = vld [vmem:[%s2853_s4 + $0x3d8] sm:$0xff] }
  0x53   : > { %937 = vmatmul.mubr.f32.gmra.mrb[2].mxu0 %v2538_v52  ;;  %1990 = vmatprep.subr.bf16.mxu1 %v1989_v26  ;;  %v1965_v11 = vpack.c.bf16 %v803_v1, %v802_v28  ;;  %v838_v58 = vld [vmem:[%s2853_s4 + $0x3d0] sm:$0xff]  ;;  %v2658_v28 = vld [vmem:[#allocation3 + $0x50] sm:$0xff]  ;;  %v823_v4 = vld [vmem:[%s2853_s4 + $0x358] sm:$0xff] }
  0x54   : > { %1042 = vmatmul.mubr.f32.gmra.mrb[2].mxu1 %v2547_v56  ;;  %1960 = vmatpush3.bf16.msra.mxu0 %v1959_v53  ;;  %v2001_v53 = vpack.c.bf16 %v837_v19, %v836_v18  ;;  %v790_v63 = vld [vmem:[%s2853_s4 + $0x250] sm:$0xff]  ;;  %v2005_v5 = vpack.c.bf16 %v839_v59, %v838_v58  ;;  %v841_v12 = vld [vmem:[%s2853_s4 + $0x3e8] sm:$0xff]  ;;  %v824_v19 = vld [vmem:[%s2853_s4 + $0x360] sm:$0xff] }
  0x55   : > { %1992 = vmatpush3.bf16.msra.mxu1 %v1991_v57  ;;  %941 = vmatprep.mubr.f32.mxu0 %v2556_v60  ;;  %v1971_v57 = vpack.c.bf16 %v789_v24, %v788_v23  ;;  %v2674_v8 = vld [vmem:[#allocation2 + $0x50] sm:$0xff]  ;;  %v811_v24 = vld [vmem:[%s2853_s4 + $0x2f8] sm:$0xff]  ;;  %v2726_v59 = vld [vmem:[#allocation3 + $0x70] sm:$0xff] }
  0x56   : > { %1046 = vmatprep.mubr.f32.mxu1 %v2225_v29  ;;  %1962 = vmatprep.subr.bf16.mxu0 %v1961_v61  ;;  %v804_v29 = vld [vmem:[%s2853_s4 + $0x2c0] sm:$0xff]  ;;  %v2683_v13 = vld [vmem:[#allocation2 + $0x51] sm:$0xff] }
  0x57   : > { %942 = vmatmul.mubr.f32.gmra.mrb[4].mxu0 %v2572_v2  ;;  %1994 = vmatprep.subr.bf16.mxu1 %v1993_v0  ;;  %v1969_v26 = vpack.c.bf16 %v805_v15, %v804_v29  ;;  %v2649_v61 = vld [vmem:[#allocation2 + $0x41] sm:$0xff]  ;;  %v791_v0 = vld [vmem:[%s2853_s4 + $0x258] sm:$0xff]  ;;  %v842_v51 = vld [vmem:[%s2853_s4 + $0x3f0] sm:$0xff] }
  0x58   : > { %1047 = vmatmul.mubr.f32.gmra.mrb[4].mxu1 %v2581_v6  ;;  %1964 = vmatpush3.bf16.msra.mxu0 %v1963_v3  ;;  %v822_v3 = vld [vmem:[%s2853_s4 + $0x350] sm:$0xff]  ;;  %v1975_v9 = vpack.c.bf16 %v791_v0, %v790_v63  ;;  %v792_v29 = vld [vmem:[%s2853_s4 + $0x260] sm:$0xff]  ;;  %v793_v15 = vld [vmem:[%s2853_s4 + $0x268] sm:$0xff] }
  0x59   : > { %1996 = vmatpush3.bf16.msra.mxu1 %v1995_v7  ;;  %946 = vmatprep.mubr.f32.mxu0 %v2590_v10  ;;  %v809_v7 = vld [vmem:[%s2853_s4 + $0x2e8] sm:$0xff]  ;;  %v1979_v27 = vpack.c.bf16 %v793_v15, %v792_v29  ;;  %v795_v58 = vld [vmem:[%s2853_s4 + $0x278] sm:$0xff]  ;;  %v826_v63 = vld [vmem:[%s2853_s4 + $0x370] sm:$0xff] }
  0x5a   : > { %1051 = vmatprep.mubr.f32.mxu1 %v2228_v30  ;;  %1966 = vmatprep.subr.bf16.mxu0 %v1965_v11  ;;  %v806_v30 = vld [vmem:[%s2853_s4 + $0x2d0] sm:$0xff]  ;;  %v840_v11 = vld [vmem:[%s2853_s4 + $0x3e0] sm:$0xff]  ;;  %v827_v0 = vld [vmem:[%s2853_s4 + $0x378] sm:$0xff] }
  0x5b   : > { %947 = vmatmul.mubr.f32.gmra.mrb[6].mxu0 %v2606_v16  ;;  %1998 = vmatprep.subr.bf16.mxu1 %v1997_v14  ;;  %v1973_v1 = vpack.c.bf16 %v807_v54, %v806_v30  ;;  %v2007_v14 = vpack.c.bf16 %v823_v4, %v822_v3  ;;  %v2009_v23 = vpack.c.bf16 %v841_v12, %v840_v11  ;;  %v2717_v30 = vld [vmem:[#allocation2 + $0x61] sm:$0xff]  ;;  %v2742_v4 = vld [vmem:[#allocation2 + $0x70] sm:$0xff]  ;;  %v847_v12 = vld [vmem:[%s2853_s4 + $0x418] sm:$0xff] }
  0x5c   : > { %1052 = vmatmul.mubr.f32.gmra.mrb[6].mxu1 %v2615_v20  ;;  %1968 = vmatpush3.bf16.msra.mxu0 %v1967_v17  ;;  %v2692_v17 = vld [vmem:[#allocation3 + $0x60] sm:$0xff]  ;;  %v845_v3 = vld [vmem:[%s2853_s4 + $0x408] sm:$0xff] }
  0x5d   : > { %2000 = vmatpush3.bf16.msra.mxu1 %v1999_v21  ;;  %951 = vmatprep.mubr.f32.mxu0 %v2624_v25  ;;  %v825_v21 = vld [vmem:[%s2853_s4 + $0x368] sm:$0xff]  ;;  %v846_v11 = vld [vmem:[%s2853_s4 + $0x410] sm:$0xff] }
  0x5e   : > { %1056 = vmatprep.mubr.f32.mxu1 %v2231_v31  ;;  %1970 = vmatprep.subr.bf16.mxu0 %v1969_v26  ;;  %v808_v31 = vld [vmem:[%s2853_s4 + $0x2e0] sm:$0xff]  ;;  %v2011_v54 = vpack.c.bf16 %v825_v21, %v824_v19  ;;  %v849_v29 = vld [vmem:[%s2853_s4 + $0x428] sm:$0xff] }
  0x5f   : > { %952 = vmatmul.mubr.f32.gmra.mrb[8].mxu0 %v2640_v55  ;;  %2002 = vmatprep.subr.bf16.mxu1 %v2001_v53  ;;  %v1977_v18 = vpack.c.bf16 %v809_v7, %v808_v31  ;;  %v2708_v26 = vld [vmem:[#allocation2 + $0x60] sm:$0xff]  ;;  %v843_v53 = vld [vmem:[%s2853_s4 + $0x3f8] sm:$0xff]  ;;  %v2015_v7 = vpack.c.bf16 %v827_v0, %v826_v63 }
  0x60   : > { %1057 = vmatmul.mubr.f32.gmra.mrb[8].mxu1 %v2649_v61  ;;  %1972 = vmatpush3.bf16.msra.mxu0 %v1971_v57  ;;  %v794_v57 = vld [vmem:[%s2853_s4 + $0x270] sm:$0xff] }
  0x61   : > { %2004 = vmatpush3.bf16.msra.mxu1 %v2003_v62  ;;  %956 = vmatprep.mubr.f32.mxu0 %v2658_v28  ;;  %v2745_v31 = vld [vmem:[#allocation2 + $0x71] sm:$0xff] }
  0x62   : > { %1061 = vmatprep.mubr.f32.mxu1 %v2234_v32  ;;  %1974 = vmatprep.subr.bf16.mxu0 %v1973_v1  ;;  %v810_v32 = vld [vmem:[%s2853_s4 + $0x2f0] sm:$0xff]  ;;  %v2013_v1 = vpack.c.bf16 %v843_v53, %v842_v51 }
  0x63   : > { %957 = vmatmul.mubr.f32.gmra.mrb[10].mxu0 %v2674_v8  ;;  %2006 = vmatprep.subr.bf16.mxu1 %v2005_v5  ;;  %v1981_v62 = vpack.c.bf16 %v811_v24, %v810_v32  ;;  %v1983_v5 = vpack.c.bf16 %v795_v58, %v794_v57 }
  0x64   : > { %1062 = vmatmul.mubr.f32.gmra.mrb[10].mxu1 %v2683_v13  ;;  %1976 = vmatpush3.bf16.msra.mxu0 %v1975_v9 }
  0x65   : > { %2008 = vmatpush3.bf16.msra.mxu1 %v2007_v14  ;;  %961 = vmatprep.mubr.f32.mxu0 %v2692_v17  ;;  %v848_v14 = vld [vmem:[%s2853_s4 + $0x420] sm:$0xff] }
  0x66   : > { %1066 = vmatprep.mubr.f32.mxu1 %v2237_v33  ;;  %1978 = vmatprep.subr.bf16.mxu0 %v1977_v18  ;;  %v844_v33 = vld [vmem:[%s2853_s4 + $0x400] sm:$0xff] }
  0x67   : > { %962 = vmatmul.mubr.f32.gmra.mrb[12].mxu0 %v2708_v26  ;;  %2010 = vmatprep.subr.bf16.mxu1 %v2009_v23  ;;  %v2017_v9 = vpack.c.bf16 %v845_v3, %v844_v33 }
  0x68   : > { %1067 = vmatmul.mubr.f32.gmra.mrb[12].mxu1 %v2717_v30  ;;  %1980 = vmatpush3.bf16.msra.mxu0 %v1979_v27 }
  0x69   : > { %2012 = vmatpush3.bf16.msra.mxu1 %v2011_v54  ;;  %966 = vmatprep.mubr.f32.mxu0 %v2726_v59 }
  0x6a   : > { %1071 = vmatprep.mubr.f32.mxu1 %v2240_v34  ;;  %1982 = vmatprep.subr.bf16.mxu0 %v1981_v62  ;;  %v2021_v34 = vpack.c.bf16 %v847_v12, %v846_v11 }
  0x6b   : > { %967 = vmatmul.mubr.f32.gmra.mrb[14].mxu0 %v2742_v4  ;;  %2014 = vmatprep.subr.bf16.mxu1 %v2013_v1 }
  0x6c   : > { %1072 = vmatmul.mubr.f32.gmra.mrb[14].mxu1 %v2745_v31  ;;  %1984 = vmatpush3.bf16.msra.mxu0 %v1983_v5 }
  0x6d   : > { %2016 = vmatpush3.bf16.msra.mxu1 %v2015_v7  ;;  %1141 = vmatprep.mubr.f32.mxu0 %v2267_v43  ;;  %v2025_v43 = vpack.c.bf16 %v849_v29, %v848_v14 }
  0x6e   : > { %1246 = vmatprep.mubr.f32.mxu1 %v2524_v22  ;;  %2018 = vmatprep.subr.bf16.mxu0 %v2017_v9  ;;  %v851_v22 = vld [vmem:[%s2853_s4 + $0x438] sm:$0xff] }
  0x6f   : > { %1142 = vmatmul.mubr.f32.vlgmr.msra.gmra.mrb[16].mxu0 %v2243_v35  ;;  %2049 = vmatprep.subr.bf16.mxu1 %v2017_v9  ;;  %v850_v35 = vld [vmem:[%s2853_s4 + $0x430] sm:$0xff] }
  0x70   : > { %1247 = vmatmul.mubr.f32.vlgmr.msra.gmra.mrb[16].mxu1 %v2538_v52  ;;  %2020 = vmatpush3.bf16.msra.mxu0 %v2017_v9  ;;  %v853_v52 = vld [vmem:[%s2853_s4 + $0x448] sm:$0xff] }
  0x71   : > { %2057 = vmatpush3.bf16.msra.mxu1 %v2017_v9  ;;  %1146 = vmatprep.mubr.f32.mxu0 %v2270_v44  ;;  %v2029_v44 = vpack.c.bf16 %v851_v22, %v850_v35 }
  0x72   : > { %1251 = vmatprep.mubr.f32.mxu1 %v2556_v60  ;;  %2022 = vmatprep.subr.bf16.mxu0 %v2021_v34  ;;  %v855_v60 = vld [vmem:[%s2853_s4 + $0x458] sm:$0xff] }
  0x73   : > { %1147 = vmatmul.mubr.f32.gmra.mrb[18].mxu0 %v2246_v36  ;;  %2050 = vmatprep.subr.bf16.mxu1 %v2021_v34  ;;  %v852_v36 = vld [vmem:[%s2853_s4 + $0x440] sm:$0xff] }
  0x74   : > { %1252 = vmatmul.mubr.f32.gmra.mrb[18].mxu1 %v2572_v2  ;;  %2024 = vmatpush3.bf16.msra.mxu0 %v2021_v34  ;;  %v857_v2 = vld [vmem:[%s2853_s4 + $0x468] sm:$0xff] }
  0x75   : > { %2058 = vmatpush3.bf16.msra.mxu1 %v2021_v34  ;;  %1151 = vmatprep.mubr.f32.mxu0 %v2273_v45  ;;  %v2033_v45 = vpack.c.bf16 %v853_v52, %v852_v36 }
  0x76   : > { %1256 = vmatprep.mubr.f32.mxu1 %v2590_v10  ;;  %2026 = vmatprep.subr.bf16.mxu0 %v2025_v43  ;;  %v859_v10 = vld [vmem:[%s2853_s4 + $0x478] sm:$0xff] }
  0x77   : > { %1152 = vmatmul.mubr.f32.gmra.mrb[20].mxu0 %v2249_v37  ;;  %2051 = vmatprep.subr.bf16.mxu1 %v2025_v43  ;;  %v854_v37 = vld [vmem:[%s2853_s4 + $0x450] sm:$0xff] }
  0x78   : > { %1257 = vmatmul.mubr.f32.gmra.mrb[20].mxu1 %v2606_v16  ;;  %2028 = vmatpush3.bf16.msra.mxu0 %v2025_v43  ;;  %v602_v16 = vld [vmem:[#allocation2 + $0x80] sm:$0xff] }
  0x79   : > { %2059 = vmatpush3.bf16.msra.mxu1 %v2025_v43  ;;  %1156 = vmatprep.mubr.f32.mxu0 %v2276_v46  ;;  %v2037_v46 = vpack.c.bf16 %v855_v60, %v854_v37 }
  0x7a   : > { %1261 = vmatprep.mubr.f32.mxu1 %v2624_v25  ;;  %2030 = vmatprep.subr.bf16.mxu0 %v2029_v44 }
  0x7b   : > { %1157 = vmatmul.mubr.f32.gmra.mrb[22].mxu0 %v2252_v38  ;;  %2052 = vmatprep.subr.bf16.mxu1 %v2029_v44  ;;  %v856_v38 = vld [vmem:[%s2853_s4 + $0x460] sm:$0xff] }
  0x7c   : > { %1262 = vmatmul.mubr.f32.gmra.mrb[22].mxu1 %v2640_v55  ;;  %2032 = vmatpush3.bf16.msra.mxu0 %v2029_v44 }
  0x7d   : > { %2060 = vmatpush3.bf16.msra.mxu1 %v2029_v44  ;;  %1161 = vmatprep.mubr.f32.mxu0 %v2279_v47  ;;  %v2041_v47 = vpack.c.bf16 %v857_v2, %v856_v38 }
  0x7e   : > { %1266 = vmatprep.mubr.f32.mxu1 %v2658_v28  ;;  %2034 = vmatprep.subr.bf16.mxu0 %v2033_v45 }
  0x7f   : > { %1162 = vmatmul.mubr.f32.gmra.mrb[24].mxu0 %v2255_v39  ;;  %2053 = vmatprep.subr.bf16.mxu1 %v2033_v45  ;;  %v858_v39 = vld [vmem:[%s2853_s4 + $0x470] sm:$0xff] }
  0x80   : > { %1267 = vmatmul.mubr.f32.gmra.mrb[24].mxu1 %v2674_v8  ;;  %2036 = vmatpush3.bf16.msra.mxu0 %v2033_v45 }
  0x81   : > { %2061 = vmatpush3.bf16.msra.mxu1 %v2033_v45  ;;  %1166 = vmatprep.mubr.f32.mxu0 %v2282_v48  ;;  %v2045_v48 = vpack.c.bf16 %v859_v10, %v858_v39 }
  0x82   : > { %1271 = vmatprep.mubr.f32.mxu1 %v2692_v17  ;;  %2038 = vmatprep.subr.bf16.mxu0 %v2037_v46 }
  0x83   : > { %1167 = vmatmul.mubr.f32.gmra.mrb[26].mxu0 %v2258_v40  ;;  %2054 = vmatprep.subr.bf16.mxu1 %v2037_v46  ;;  %v619_v40 = vld [vmem:[#allocation3 + $0x80] sm:$0xff] }
  0x84   : > { %1272 = vmatmul.mubr.f32.gmra.mrb[26].mxu1 %v2708_v26  ;;  %2040 = vmatpush3.bf16.msra.mxu0 %v2037_v46 }
  0x85   : > { %2062 = vmatpush3.bf16.msra.mxu1 %v2037_v46  ;;  %1171 = vmatprep.mubr.f32.mxu0 %v2285_v49 }
  0x86   : > { %1276 = vmatprep.mubr.f32.mxu1 %v2726_v59  ;;  %2042 = vmatprep.subr.bf16.mxu0 %v2041_v47 }
  0x87   : > { %1172 = vmatmul.mubr.f32.gmra.mrb[28].mxu0 %v2261_v41  ;;  %2055 = vmatprep.subr.bf16.mxu1 %v2041_v47  ;;  %v635_v41 = vld [vmem:[#allocation2 + $0x81] sm:$0xff] }
  0x88   : > { %1277 = vmatmul.mubr.f32.gmra.mrb[28].mxu1 %v2742_v4  ;;  %2044 = vmatpush3.bf16.msra.mxu0 %v2041_v47 }
  0x89   : > { %2063 = vmatpush3.bf16.msra.mxu1 %v2041_v47  ;;  %1176 = vmatprep.mubr.f32.mxu0 %v2288_v50  ;;  %v1589_v50 = vld [vmem:[%s2854_s5] ss:$0 sm:$0xff] }
  0x8a   : > { %1281 = vmatprep.mubr.f32.mxu1 %v619_v40  ;;  %2046 = vmatprep.subr.bf16.mxu0 %v2045_v48 }
  0x8b   : > { %1177 = vmatmul.mubr.f32.gmra.mrb[30].mxu0 %v2264_v42  ;;  %2056 = vmatprep.subr.bf16.mxu1 %v2045_v48 }
  0x8c   : > { %1282 = vmatmul.mubr.f32.gmra.mrb[30].mxu1 %v602_v16  ;;  %2048 = vmatpush3.bf16.msra.mxu0 %v2045_v48 }
  0x8d   : > { %2064 = vmatpush3.bf16.msra.mxu1 %v2045_v48  ;;  %1877 = vmatprep.mubr.f32.mxu0 %v2547_v56 }
  0x8e   : > { %1883 = vmatprep.mubr.f32.mxu1 %v2683_v13 }
  0x8f   : > { %1878 = vmatmul.mubr.f32.vlgmr.msra.gmra.mrb[32].mxu0 %v2581_v6 }
  0x90   : > { %1884 = vmatmul.mubr.f32.vlgmr.msra.gmra.mrb[32].mxu1 %v2717_v30  ;;  %1880 = vmatprep.mubr.f32.mxu0 %v2615_v20 }
  0x91   : > { %1886 = vmatprep.mubr.f32.mxu1 %v2745_v31 }
  0x93   : > { %1881 = vmatmul.mubr.f32.gmra.mrb[34].mxu0 %v2649_v61 }
  0x94   : > { %1887 = vmatmul.mubr.f32.gmra.mrb[34].mxu1 %v635_v41 }
 0x122   : > { %v1629_v42 = vpop.f32.mrb[0].mxu0 }
 0x123   : > { %v1685_v49 = vpop.f32.mrb[0].mxu1  ;;  %v1630_v56 = vpop.f32.mrb[1].mxu0 }
 0x124   : > { %v1631_v25 = vadd.f32 %v1630_v56, %v1629_v42  ;;  %v1686_v55 = vpop.f32.mrb[1].mxu1 }
 0x125   : > { %v1687_v6 = vadd.f32 %v1686_v55, %v1685_v49 }
 0x126   : > { %v934_v28 = vadd.f32 %v1631_v25, %v1589_v50  ;;  %v1632_v8 = vpop.f32.mrb[2].mxu0 }
 0x127   : > { %v1688_v13 = vpop.f32.mrb[2].mxu1  ;;  %v1633_v20 = vpop.f32.mrb[3].mxu0 }
 0x128   : > { %v1039_v15 = vadd.f32 %v1687_v6, %v934_v28  ;;  %v1634_v17 = vadd.f32 %v1633_v20, %v1632_v8  ;;  %v1689_v18 = vpop.f32.mrb[3].mxu1 }
 0x129   : > { %v1690_v19 = vadd.f32 %v1689_v18, %v1688_v13 }
 0x12a   : > { %v939_v61 = vadd.f32 %v1634_v17, %v1589_v50  ;;  %v1635_v21 = vpop.f32.mrb[4].mxu0 }
 0x12b   : > { %v1691_v23 = vpop.f32.mrb[4].mxu1  ;;  %v1636_v32 = vpop.f32.mrb[5].mxu0 }
 0x12c   : > { %v1044_v24 = vadd.f32 %v1690_v19, %v939_v61  ;;  %v1637_v26 = vadd.f32 %v1636_v32, %v1635_v21  ;;  %v1692_v27 = vpop.f32.mrb[5].mxu1 }
 0x12d   : > { %v1693_v51 = vadd.f32 %v1692_v27, %v1691_v23 }
 0x12e   : > { %v944_v53 = vadd.f32 %v1637_v26, %v1589_v50  ;;  %v1638_v30 = vpop.f32.mrb[6].mxu0 }
 0x12f   : > { %v1694_v54 = vpop.f32.mrb[6].mxu1  ;;  %v1639_v57 = vpop.f32.mrb[7].mxu0 }
 0x130   : > { %v1049_v58 = vadd.f32 %v1693_v51, %v944_v53  ;;  %v1640_v59 = vadd.f32 %v1639_v57, %v1638_v30  ;;  %v1695_v62 = vpop.f32.mrb[7].mxu1 }
 0x131   : > { %v1696_v63 = vadd.f32 %v1695_v62, %v1694_v54 }
 0x132   : > { %v949_v0 = vadd.f32 %v1640_v59, %v1589_v50  ;;  %v1641_v1 = vpop.f32.mrb[8].mxu0 }
 0x133   : > { %v1697_v33 = vpop.f32.mrb[8].mxu1  ;;  %v1642_v3 = vpop.f32.mrb[9].mxu0 }
 0x134   : > { %v1054_v4 = vadd.f32 %v1696_v63, %v949_v0  ;;  %v1643_v5 = vadd.f32 %v1642_v3, %v1641_v1  ;;  %v1698_v31 = vpop.f32.mrb[9].mxu1 }
 0x135   : > { %v1699_v7 = vadd.f32 %v1698_v31, %v1697_v33 }
 0x136   : > { %v954_v9 = vadd.f32 %v1643_v5, %v1589_v50  ;;  %v1644_v11 = vpop.f32.mrb[10].mxu0 }
 0x137   : > { %v1700_v12 = vpop.f32.mrb[10].mxu1  ;;  %v1645_v34 = vpop.f32.mrb[11].mxu0 }
 0x138   : > { %v1059_v14 = vadd.f32 %v1699_v7, %v954_v9  ;;  %v1646_v29 = vadd.f32 %v1645_v34, %v1644_v11  ;;  %v1701_v43 = vpop.f32.mrb[11].mxu1 }
 0x139   : > { %v1702_v35 = vadd.f32 %v1701_v43, %v1700_v12 }
 0x13a   : > { %v959_v22 = vadd.f32 %v1646_v29, %v1589_v50  ;;  %v1647_v44 = vpop.f32.mrb[12].mxu0 }
 0x13b   : > { %v1703_v36 = vpop.f32.mrb[12].mxu1  ;;  %v1648_v52 = vpop.f32.mrb[13].mxu0 }
 0x13c   : > { %v1064_v45 = vadd.f32 %v1702_v35, %v959_v22  ;;  %v1649_v37 = vadd.f32 %v1648_v52, %v1647_v44  ;;  %v1704_v60 = vpop.f32.mrb[13].mxu1 }
 0x13d   : > { %v1705_v46 = vadd.f32 %v1704_v60, %v1703_v36 }
 0x13e   : > { %v964_v38 = vadd.f32 %v1649_v37, %v1589_v50  ;;  %v1650_v2 = vpop.f32.mrb[14].mxu0 }
 0x13f   : > { %v1706_v47 = vpop.f32.mrb[14].mxu1  ;;  %v1651_v39 = vpop.f32.mrb[15].mxu0 }
 0x140   : > { %v1069_v10 = vadd.f32 %v1705_v46, %v964_v38  ;;  %v1652_v48 = vadd.f32 %v1651_v39, %v1650_v2  ;;  %v1707_v40 = vpop.f32.mrb[15].mxu1 }
 0x141   : > { %v1708_v16 = vadd.f32 %v1707_v40, %v1706_v47 }
 0x142   : > { %v969_v41 = vadd.f32 %v1652_v48, %v1589_v50  ;;  %v1741_v42 = vpop.f32.mrb[16].mxu0 }
 0x143   : > { %v1797_v49 = vpop.f32.mrb[16].mxu1  ;;  %v1742_v56 = vpop.f32.mrb[17].mxu0 }
 0x144   : > { %v1074_v25 = vadd.f32 %v1708_v16, %v969_v41  ;;  %v1743_v55 = vadd.f32 %v1742_v56, %v1741_v42  ;;  %v1798_v6 = vpop.f32.mrb[17].mxu1 }
 0x145   : > { %v1799_v28 = vadd.f32 %v1798_v6, %v1797_v49 }
 0x146   : > { %v1144_v8 = vadd.f32 %v1743_v55, %v1039_v15  ;;  %v1744_v13 = vpop.f32.mrb[18].mxu0 }
 0x147   : > { %v1800_v20 = vpop.f32.mrb[18].mxu1  ;;  %v1745_v17 = vpop.f32.mrb[19].mxu0 }
 0x148   : > { %v1746_v18 = vadd.f32 %v1745_v17, %v1744_v13  ;;  %v1801_v19 = vpop.f32.mrb[19].mxu1  ;;  %v1249_v61 = vadd.f32 %v1799_v28, %v1144_v8 }
 0x149   : > { %v1802_v21 = vadd.f32 %v1801_v19, %v1800_v20 }
 0x14a   : > { %v1149_v23 = vadd.f32 %v1746_v18, %v1044_v24  ;;  %v1747_v32 = vpop.f32.mrb[20].mxu0 }
 0x14b   : > { %v1803_v26 = vpop.f32.mrb[20].mxu1  ;;  %v1748_v27 = vpop.f32.mrb[21].mxu0 }
 0x14c   : > { %v1749_v50 = vadd.f32 %v1748_v27, %v1747_v32  ;;  %v1804_v51 = vpop.f32.mrb[21].mxu1  ;;  %v1254_v53 = vadd.f32 %v1802_v21, %v1149_v23 }
 0x14d   : > { %v1805_v30 = vadd.f32 %v1804_v51, %v1803_v26 }
 0x14e   : > { %v1154_v54 = vadd.f32 %v1749_v50, %v1049_v58  ;;  %v1750_v57 = vpop.f32.mrb[22].mxu0 }
 0x14f   : > { %v1806_v59 = vpop.f32.mrb[22].mxu1  ;;  %v1751_v62 = vpop.f32.mrb[23].mxu0 }
 0x150   : > { %v1752_v15 = vadd.f32 %v1751_v62, %v1750_v57  ;;  %v1807_v63 = vpop.f32.mrb[23].mxu1  ;;  %v1259_v0 = vadd.f32 %v1805_v30, %v1154_v54 }
 0x151   : > { %v1808_v1 = vadd.f32 %v1807_v63, %v1806_v59 }
 0x152   : > { %v1159_v33 = vadd.f32 %v1752_v15, %v1054_v4  ;;  %v1753_v3 = vpop.f32.mrb[24].mxu0 }
 0x153   : > { %v1809_v5 = vpop.f32.mrb[24].mxu1  ;;  %v1754_v31 = vpop.f32.mrb[25].mxu0 }
 0x154   : > { %v1755_v24 = vadd.f32 %v1754_v31, %v1753_v3  ;;  %v1810_v7 = vpop.f32.mrb[25].mxu1  ;;  %v1264_v9 = vadd.f32 %v1808_v1, %v1159_v33 }
 0x155   : > { %v1811_v11 = vadd.f32 %v1810_v7, %v1809_v5 }
 0x156   : > { %v1164_v12 = vadd.f32 %v1755_v24, %v1059_v14  ;;  %v1756_v34 = vpop.f32.mrb[26].mxu0 }
 0x157   : > { %v1812_v29 = vpop.f32.mrb[26].mxu1  ;;  %v1757_v43 = vpop.f32.mrb[27].mxu0 }
 0x158   : > { %v1758_v58 = vadd.f32 %v1757_v43, %v1756_v34  ;;  %v1813_v35 = vpop.f32.mrb[27].mxu1  ;;  %v1269_v22 = vadd.f32 %v1811_v11, %v1164_v12 }
 0x159   : > { %v1814_v44 = vadd.f32 %v1813_v35, %v1812_v29 }
 0x15a   : > { %v1169_v36 = vadd.f32 %v1758_v58, %v1064_v45  ;;  %v1759_v52 = vpop.f32.mrb[28].mxu0 }
 0x15b   : > { %v1815_v37 = vpop.f32.mrb[28].mxu1  ;;  %v1760_v60 = vpop.f32.mrb[29].mxu0 }
 0x15c   : > { %v1761_v4 = vadd.f32 %v1760_v60, %v1759_v52  ;;  %v1816_v46 = vpop.f32.mrb[29].mxu1  ;;  %v1274_v38 = vadd.f32 %v1814_v44, %v1169_v36 }
 0x15d   : > { %v1817_v2 = vadd.f32 %v1816_v46, %v1815_v37 }
 0x15e   : > { %v1174_v47 = vadd.f32 %v1761_v4, %v1069_v10  ;;  %v1762_v39 = vpop.f32.mrb[30].mxu0 }
 0x15f   : > { %v1818_v48 = vpop.f32.mrb[30].mxu1  ;;  %v1763_v14 = vpop.f32.mrb[31].mxu0 }
 0x160   : > { %v1764_v40 = vadd.f32 %v1763_v14, %v1762_v39  ;;  %v1819_v16 = vpop.f32.mrb[31].mxu1  ;;  %v1279_v41 = vadd.f32 %v1817_v2, %v1174_v47 }
 0x161   : > { %v1820_v42 = vadd.f32 %v1819_v16, %v1818_v48 }
 0x162   : > { %v1179_v45 = vadd.f32 %v1764_v40, %v1074_v25  ;;  %v1879_v49 = vpop.f32.mrb[32].mxu0 }
 0x163   : > { %v1359_v56 = vadd.f32 %v1879_v49, %v1254_v53  ;;  %v1885_v55 = vpop.f32.mrb[32].mxu1  ;;  %v1353_v6 = vpop.f32.mrb[33].mxu0 }
 0x164   : > { %v1379_v28 = vadd.f32 %v1885_v55, %v1274_v38  ;;  %v1354_v8 = vadd.f32 %v1353_v6, %v1249_v61  ;;  %v1373_v10 = vpop.f32.mrb[33].mxu1  ;;  %v1284_v13 = vadd.f32 %v1820_v42, %v1179_v45 }
 0x165   : > { %1393 = vst [vmem:[%s2201_s16 + $0x8] sm:$0xff] %v1359_v56  ;;  %v1374_v20 = vadd.f32 %v1373_v10, %v1269_v22 }
 0x166   : > { %1397 = vst [vmem:[%s2201_s16 + $0x28] sm:$0xff] %v1379_v28  ;;  %1392 = vst [vmem:[%s2201_s16] sm:$0xff] %v1354_v8  ;;  %v1882_v17 = vpop.f32.mrb[34].mxu0 }
 0x167   : > { %1396 = vst [vmem:[%s2201_s16 + $0x20] sm:$0xff] %v1374_v20  ;;  %v1369_v18 = vadd.f32 %v1882_v17, %v1264_v9  ;;  %v1888_v25 = vpop.f32.mrb[34].mxu1  ;;  %v1363_v19 = vpop.f32.mrb[35].mxu0 }
 0x168   : > { %v1389_v21 = vadd.f32 %v1888_v25, %v1284_v13  ;;  %v1364_v23 = vadd.f32 %v1363_v19, %v1259_v0  ;;  %v1383_v32 = vpop.f32.mrb[35].mxu1 }
 0x169   : > { %1395 = vst [vmem:[%s2201_s16 + $0x18] sm:$0xff] %v1369_v18  ;;  %v1384_v26 = vadd.f32 %v1383_v32, %v1279_v41 }
 0x16a   : > { %1399 = vst [vmem:[%s2201_s16 + $0x38] sm:$0xff] %v1389_v21  ;;  %1394 = vst [vmem:[%s2201_s16 + $0x10] sm:$0xff] %v1364_v23 }
 0x16b   : > { %1398 = vst [vmem:[%s2201_s16 + $0x30] sm:$0xff] %v1384_v26 }
 0x16c PF: > { %s16_s23 = sadd.s32 1, %s2115_s23   ;;  %s2856_s21 = smov %s2111_s22 }
 0x16d   : > { %p13_p5 = scmp.ge.s32.totalorder %s16_s23, 4   ;;  %s2857_s22 = smov %s2859_s24 }
 0x16f   :  { %15 = sbr.rel (!%p13_p5) target bundleno = 2 (0x2), region = 177 }
 0x176   :  { %1430 = vsyncmov [#allocation5] }
 0x179   :  { %s1431_s9 = vpop.sfrf %1430 }
 0x17a   :  { %p1592_p6 = scmp.ne.s32.totalorder %s1431_s9, 0 }
 0x17c   :  { %1435 = shalt.err (%p1592_p6)  }
 0x17d   :  { %1437 = vsyncmov [#allocation5 + $0x1] }
 0x180   :  { %s1438_s10 = vpop.sfrf %1437 }
 0x181   :  { %p1593_p7 = scmp.ne.s32.totalorder %s1438_s10, 0 }
 0x183   :  { %1442 = shalt.err (%p1593_p7)  }

</bundles_post_ra>
